<compile_context>
chip_gen: v6e
topology: v6e:2x2x1
jax: 0.10.0
libtpu: 0.0.40
codegen_flags: <defaults>
</compile_context>

<pallas_src>
import jax
import jax.numpy as jnp
from jax import lax
from jax.experimental import pallas as pl
from jax.experimental.pallas import tpu as pltpu


def _fpn_tiny_kernel(w_ref, p_ref, o_ref):
    # w_ref: (Cout, KKC_pad)  bf16  conv weight with BN scale folded; column KKC holds the
    #                               folded BN bias (paired with a ones-row in the patches),
    #                               remaining columns are zero padding.
    # p_ref: (KKC_pad, TL)    bf16  im2col patches for TL output pixels (space on lanes).
    # o_ref: (Cout, TL)       f32   lane-dense output tile (unmasked stores).
    y = jnp.dot(w_ref[...], p_ref[...], preferred_element_type=jnp.float32)
    o_ref[...] = jnp.maximum(y, 0.0).astype(o_ref.dtype)  # bias already in the matmul


def _pick_lane_tile(nl):
    # Largest lane tile (multiple of 128) that still leaves >=2 grid steps, so v7x's two
    # TensorCores can each take a slice; otherwise fall back to one full-width step.
    for tl in (1024, 512, 256, 128):
        if nl % tl == 0 and nl // tl >= 2:
            return tl
    return nl


def fpn_tiny_forward(x_nchw, weight, gamma, beta, running_mean, running_var,
                     *, eps=1e-5):
    """Conv2d(K, stride=1, pad=(K-1)//2, bias=False) + BatchNorm2d(eval) + ReLU.

    x_nchw : (N, Cin, H, W)   weight : (Cout, Cin, K, K)   (PyTorch layouts)
    returns (N, Cout, H, W)
    """
    N, Cin, H, W = x_nchw.shape
    Cout, _, K, _ = weight.shape
    pad = (K - 1) // 2
    HW = H * W
    NL = N * HW
    KKC = Cin * K * K
    # +1 row for the folded-bias ones-row; pad contraction dim to the bf16 sublane tile.
    KKC_pad = ((KKC + 1 + 15) // 16) * 16

    # ---- plain-JAX one-time prep: BN folding + weight/bias packing -----------------
    scale = gamma / jnp.sqrt(running_var + eps)                        # (Cout,)
    bias = beta - running_mean * scale                                 # (Cout,)
    w_mat = (weight.reshape(Cout, KKC).astype(jnp.float32)
             * scale.astype(jnp.float32)[:, None])                     # (Cout, KKC)
    w_mat = jnp.concatenate(
        [w_mat,
         bias.reshape(Cout, 1).astype(jnp.float32),                    # bias column @ KKC
         jnp.zeros((Cout, KKC_pad - KKC - 1), jnp.float32)], axis=1
    ).astype(jnp.bfloat16)                                             # (Cout, KKC_pad)

    # ---- im2col: patches[ci*K*K + kh*K + kw, n*HW + h*W + w] = x_pad[n,ci,h+kh,w+kw] ----
    x_pad = jnp.pad(x_nchw, ((0, 0), (0, 0), (pad, pad), (pad, pad)))
    cols = [x_pad[:, :, kh:kh + H, kw:kw + W]
            for kh in range(K) for kw in range(K)]                     # K*K x (N,Cin,H,W)
    patches = jnp.stack(cols, axis=2).reshape(N, KKC, HW)              # (N, KKC, HW)
    patches = jnp.transpose(patches, (1, 0, 2)).reshape(KKC, NL)       # (KKC, N*HW)
    patches = jnp.concatenate(
        [patches,
         jnp.ones((1, NL), patches.dtype),                             # ones-row for bias
         jnp.zeros((KKC_pad - KKC - 1, NL), patches.dtype)], axis=0
    ).astype(jnp.bfloat16)                                             # (KKC_pad, N*HW)

    tl = _pick_lane_tile(NL)
    grid_l = NL // tl

    out = pl.pallas_call(
        _fpn_tiny_kernel,
        out_shape=jax.ShapeDtypeStruct((Cout, NL), x_nchw.dtype),
        grid=(grid_l,),
        in_specs=[
            pl.BlockSpec((Cout, KKC_pad), lambda j: (0, 0)),   # weight: constant block
            pl.BlockSpec((KKC_pad, tl), lambda j: (0, j)),     # patches: lane-column tile
        ],
        out_specs=pl.BlockSpec((Cout, tl), lambda j: (0, j)),
        compiler_params=pltpu.CompilerParams(
            dimension_semantics=("parallel",)),                # independent tiles -> v7x TCs
    )(w_mat, patches)

    # (Cout, N*HW) -> (N, Cout, H, W)  (cheap wrapper-side transpose on the small output)
    return jnp.transpose(out.reshape(Cout, N, H, W), (1, 0, 2, 3))


def _reference_forward(x_nchw, weight, gamma, beta, running_mean, running_var,
                       *, eps=1e-5):
    K = weight.shape[2]
    pad = (K - 1) // 2
    y = lax.conv_general_dilated(
        x_nchw, weight, window_strides=(1, 1),
        padding=((pad, pad), (pad, pad)),
        dimension_numbers=("NCHW", "OIHW", "NCHW"))
    scale = (gamma / jnp.sqrt(running_var + eps)).reshape(1, -1, 1, 1)
    bias = (beta - running_mean * gamma / jnp.sqrt(running_var + eps)
            ).reshape(1, -1, 1, 1)
    return jnp.maximum(y * scale + bias, 0.0)


if __name__ == "__main__":
    # Small shapes consistent with the module: FPNTiny(in=4, out=8, kernel_size=3)
    N, Cin, H, W = 2, 4, 16, 16
    Cout, K = 8, 3

    key = jax.random.PRNGKey(0)
    kx, kw, kg, kb, km, kv = jax.random.split(key, 6)

    x = jax.random.normal(kx, (N, Cin, H, W), dtype=jnp.float32)
    weight = jax.random.normal(kw, (Cout, Cin, K, K), dtype=jnp.float32) * 0.1
    gamma = 1.0 + 0.1 * jax.random.normal(kg, (Cout,), dtype=jnp.float32)
    beta = 0.1 * jax.random.normal(kb, (Cout,), dtype=jnp.float32)
    running_mean = 0.05 * jax.random.normal(km, (Cout,), dtype=jnp.float32)
    running_var = 1.0 + 0.1 * jnp.abs(jax.random.normal(kv, (Cout,), dtype=jnp.float32))

    out = fpn_tiny_forward(x, weight, gamma, beta, running_mean, running_var)
    out = jax.block_until_ready(out)

    ref = _reference_forward(x, weight, gamma, beta, running_mean, running_var)
    assert out.shape == (N, Cout, H, W)
    # Tolerance loosened for bf16 matmul operands (f32 accumulation keeps error ~1e-3).
    assert jnp.allclose(out, ref, atol=2e-2, rtol=2e-2), "mismatch vs reference"

    print("KERNEL_OK")
</pallas_src>

<mosaic_0001>
module attributes {stable_mosaic.version = 11 : i64} {
  func.func @_fpn_tiny_kernel(%arg0: i32, %arg1: memref<8x48xbf16, #tpu.memory_space<vmem>>, %arg2: memref<48x256xbf16, #tpu.memory_space<vmem>>, %arg3: memref<8x256xf32, #tpu.memory_space<vmem>>) attributes {dimension_semantics = [#tpu.dimension_semantics<parallel>], iteration_bounds = array<i64: 2>, scalar_prefetch = 0 : i64, scratch_operands = 0 : i64, tpu.core_type = #tpu.core_type<tc>, window_params = [{pipeline_mode = #tpu.pipeline_mode<synchronous>, transform_indices = @transform_0, window_bounds = array<i64: 8, 48>}, {transform_indices = @transform_1, window_bounds = array<i64: 48, 256>}, {transform_indices = @transform_2, window_bounds = array<i64: 8, 256>}]} {
    %c0 = arith.constant 0 : index
    %c0_0 = arith.constant 0 : index
    %0 = vector.load %arg1[%c0, %c0_0] : memref<8x48xbf16, #tpu.memory_space<vmem>>, vector<8x48xbf16>
    %c0_1 = arith.constant 0 : index
    %c0_2 = arith.constant 0 : index
    %1 = vector.load %arg2[%c0_1, %c0_2] : memref<48x256xbf16, #tpu.memory_space<vmem>>, vector<48x256xbf16>
    %cst = arith.constant dense<0.000000e+00> : vector<8x256xf32>
    %2 = tpu.matmul %0, %1, %cst {dimension_numbers = #tpu.dot_dimension_numbers<[1], [0], [0], [1], [0, 0, 1, 1], [], []>} : vector<8x48xbf16>, vector<48x256xbf16>, vector<8x256xf32> -> vector<8x256xf32>
    %cst_3 = arith.constant 0.000000e+00 : f32
    %3 = vector.broadcast %cst_3 : f32 to vector<8x256xf32>
    %4 = arith.maximumf %2, %3 : vector<8x256xf32>
    %c0_4 = arith.constant 0 : index
    %c0_5 = arith.constant 0 : index
    %5 = vector.load %arg3[%c0_4, %c0_5] : memref<8x256xf32, #tpu.memory_space<vmem>>, vector<8x256xf32>
    tpu.vector_store %arg3[%c0_4, %c0_5], %4 {strides = array<i32>} : memref<8x256xf32, #tpu.memory_space<vmem>>, vector<8x256xf32>,
    return
  }
  func.func @transform_0(%arg0: i32) -> (i32, i32) {
    %c0_i32 = arith.constant 0 : i32
    %c0_i32_0 = arith.constant 0 : i32
    %c0_i32_1 = arith.constant 0 : i32
    return %c0_i32, %c0_i32_0 : i32, i32
  }
  func.func @transform_1(%arg0: i32) -> (i32, i32) {
    %c0_i32 = arith.constant 0 : i32
    %c0_i32_0 = arith.constant 0 : i32
    return %c0_i32, %arg0 : i32, i32
  }
  func.func @transform_2(%arg0: i32) -> (i32, i32) {
    %c0_i32 = arith.constant 0 : i32
    %c0_i32_0 = arith.constant 0 : i32
    return %c0_i32, %arg0 : i32, i32
  }
}

</mosaic_0001>

<bundles_post_ra>
// kernel: tpu_custom_call.1
= control target key start
LH: loop header
LB: loop body
LE: loop exit
PB: predicated region body
PF: predicated region fallthrough
CT: control target
= control target key end

     0   :  { %7 = vsyncpa [#allocation3], 0  ;;  %s782_s0 = inlined_call_operand.hbm [shape: bf16[8,48], index: 0, kind: input, shape index: {}]   ;;  %s783_s1 = inlined_call_operand.hbm [shape: bf16[48,512], index: 1, kind: input, shape index: {}]   ;;  %s784_s2 = inlined_call_operand.hbm [shape: f32[8,512], index: 2, kind: output, shape index: {}]  }
   0x1   :  { %8 = vsyncpa [#allocation6], 0 }
   0x2   :  { %10 = vsyncpa [#allocation6 + $0x1], 0 }
   0x3   :  { %11 = vsyncpa [#allocation4], 0 }
   0x4   :  { %13 = vsyncpa [#allocation4 + $0x1], 0  ;;  %s602_s9 = smov 0   ;;  %s604_s10 = smov 0  }
   0x5   :  { %s606_s11 = smov 0   ;;  %s608_s12 = smov 0  }
   0x6 LB: > { %s623_s13 = sadd.s32 4294967295, %s578_s12   ;;  %s361_s14 = sadd.s32 4294967294, %s578_s12   ;;  %s578_s12 = sphi %s608_s12, %s807_s12   ;;  %s574_s11 = sphi %s606_s11, %s806_s11   ;;  %s570_s10 = sphi %s604_s10, %s805_s10   ;;  %s566_s9 = sphi %s602_s9, %s804_s9  }
   0x7   : > { %s627_s15 = sadd.s32 1, %s578_s12   ;;  %s47_s16 = sadd.s32 1, %s574_s11 }
   0x8   : > { %s44_s17 = ssub.s32 %s578_s12, %s627_s15  ;;  %p54_p0 = scmp.ne.s32.totalorder %s574_s11, %s570_s10 }
   0x9   : > { %p45_p1 = scmp.eq.s32.totalorder %s44_s17, 0  ;;  %p55_p2 = scmp.eq.s32.totalorder %s578_s12, 0 }
   0xa   : > { %p60_p3 = scmp.ne.s32.totalorder %s570_s10, %s566_s9  ;;  %p785_p4 = scmp.eq.s32.totalorder %s623_s13, 0 }
   0xb   : > { %s639_s18 = scalar_select %p45_p1, %s574_s11, %s47_s16  }
   0xc   : > { %p641_p5 = por %p55_p2, %p54_p0  ;;  %p647_p6 = por %p785_p4, %p60_p3 }
   0xd   : > { %p84_p7 = scmp.eq.s32.totalorder %s623_s13, 1  ;;  %p90_p8 = scmp.eq.s32.totalorder %s361_s14, 1 }
   0xe   : > { %s790_s20 = scalar_select %p647_p6, 1, 0 }
   0xf   : > { %p362_p9 = scmp.ge.s32.totalorder %s578_s12, 1  ;;  %p97_p10 = scmp.lt.s32.totalorder %s578_s12, 3 }
  0x10   : > { %p654_p11 = por %p84_p7, %p54_p0  ;;  %p658_p12 = por %p90_p8, %p60_p3 }
  0x11   : > { %p662_p13 = pnand %p362_p9, %p97_p10  ;;  %s580_s24 = smov [#allocation2]  }
  0x12   : > { %s791_s21 = scalar_select %p654_p11, 1, 0 }
  0x13   : > { %s792_s22 = scalar_select %p658_p12, 1, 0 }
  0x14   : > { %s793_s23 = scalar_select %p662_p13, 1, 0 }
  0x15   : > { %p394_p2 = pneg %p662_p13  ;;  %s110_s25 = sshll.u32 %s580_s24, 4  ;;  %s111_s25 = int_to_ptr.vmem [resolvable:$true] %s110_s25 }
  0x16   : > { %p407_p4 = scmp.lt.s32.totalorder %s578_s12, 2  ;;  %p794_p0 = scmp.eq.s32.totalorder %s623_s13, 0 }
  0x17   : > { %s121_s27 = sand.u32 1, %s574_s11   ;;  %s467_s30 = scalar_lea.vmem %s111_s25, 64 }
  0x18   : > { %p672_p7 = pnand %p394_p2, %p794_p0  ;;  %p679_p3 = pnand %p407_p4, %p641_p5 }
  0x19   : > { %s384_s29 = smul.u32 48, %s121_s27  ;;  %p468_p9 = scmp.ne.s32.totalorder %s111_s25, %s467_s30 }
  0x1a   : > { %p458_p8 = pneg %p672_p7  ;;  %p475_p12 = scmp.lt.s32.totalorder %s111_s25, %s111_s25 }
  0x1b   : > { %p476_p11 = scmp.lt.s32.totalorder %s467_s30, %s467_s30 }
  0x1c   : > { %p470_p10 = pnand %p468_p9, %p458_p8 }
  0x1d   : > { %p477_p2 = por %p476_p11, %p475_p12 }
  0x1e   : > { %p471_p1 = pneg %p470_p10 }
  0x20   : > { %p478_p0 = pnand %p477_p2, %p471_p1 }
  0x22   : > { %481 = shalt.err (!%p478_p0)
}
  0x23   : > { %397 = dma.hbm_to_vmem [thread:$0]  (!%p672_p7), %s782_s0, 64, %s111_s25, [#allocation3]  }
  0x24   : > { %s382_s5 = sshll.u32 %s578_s12, 7  ;;  %s125_s6 = scalar_lea.vmem [#allocation5], %s384_s29 }
  0x25   : > { %s132_s7 = sshll.u32 %s125_s6, 4  ;;  %s694_s16 = scalar_lea.hbm %s783_s1, %s382_s5  ;;  %s696_s7 = int_to_ptr.vmem [resolvable:$true] %s132_s7 }
  0x26   : > { %s698_s17 = scalar_lea.sflag [#allocation6], %s121_s27  ;;  %s482_s19 = scalar_lea.hbm %s694_s16, 768 }
  0x27   : > { %p483_p4 = scmp.ne.s32.totalorder %s694_s16, %s482_s19  ;;  %p484_p5 = pneg %p679_p3 }
  0x28   : > { %s487_s26 = scalar_lea.hbm %s783_s1, 1536  ;;  %p488_p1 = scmp.lt.s32.totalorder %s694_s16, %s783_s1 }
  0x29   : > { %p485_p11 = pnand %p484_p5, %p483_p4  ;;  %p489_p7 = scmp.lt.s32.totalorder %s487_s26, %s482_s19 }
  0x2b   : > { %p486_p12 = pneg %p485_p11  ;;  %p490_p8 = por %p489_p7, %p488_p1 }
  0x2d   : > { %p491_p9 = pnand %p490_p8, %p486_p12 }
  0x2f   : > { %494 = shalt.err (!%p491_p9)
}
  0x30   : > { %s495_s27 = scalar_lea.vmem %s696_s7, 768  ;;  %s581_s3 = smov [#allocation5]  }
  0x31   : > { %p496_p10 = scmp.ne.s32.totalorder %s696_s7, %s495_s27  ;;  %s500_s4 = sshll.u32 %s581_s3, 4  ;;  %s501_s4 = int_to_ptr.vmem [resolvable:$false] %s500_s4 }
  0x32   : > { %s502_s5 = scalar_lea.vmem %s501_s4, 1536  ;;  %p503_p4 = scmp.lt.s32.totalorder %s696_s7, %s501_s4 }
  0x33   : > { %p498_p2 = pnand %p496_p10, %p484_p5  ;;  %p504_p11 = scmp.lt.s32.totalorder %s502_s5, %s495_s27 }
  0x35   : > { %p499_p0 = pneg %p498_p2  ;;  %p505_p6 = por %p504_p11, %p503_p4 }
  0x37   : > { %p506_p13 = pnand %p505_p6, %p499_p0 }
  0x39   : > { %509 = shalt.err (!%p506_p13)
}
  0x3a   : > { %s582_s6 = smov 256   ;;  %s583_s8 = smov 128  }
  0x3b   : > { %s584_s14 = smov 8   ;;  %p797_p5 = scmp.ne.s32.totalorder %s793_s23, 0 }
  0x3c   : > { %401 = dma.hbm_to_vmem [thread:$0]  (!%p679_p3), %s694_s16, 768, %s696_s7, %s698_s17, %s582_s6, %s583_s8, %s584_s14  }
  0x3d   : > { %144 = sbr.rel (%p797_p5) target bundleno = 296 (0x128), region = 28  ;;  %p798_p12 = scmp.eq.s32.totalorder (!%p797_p5), %s623_s13, 0 }
  0x42   : > { %553 = dma.done.wait (%p798_p12), [#allocation3], 64   ;;  %p799_p1 = pmov %p798_p12 }
  0x43   : > { %s726_s19 = sand.u32 1, %s570_s10   ;;  %p800_p6 = scmp.ne.s32.totalorder %s790_s20, 0 }
  0x44   : > { %555 = vsyncadd (%p799_p1), [#allocation3], 4294967232  ;;  %s385_s24 = smul.u32 48, %s726_s19  ;;  %s151_s25 = scalar_lea.sflag [#allocation6], %s726_s19 }
  0x46   : > { %s154_s26 = scalar_lea.vmem [#allocation5], %s385_s24 }
  0x47   : > { %557 = dma.done.wait (%p800_p6), %s151_s25, 768  }
  0x48   : > { %559 = vsyncadd (%p800_p6), %s151_s25, 4294966528  ;;  %v585_v0 = vmov 0   ;;  %v447_v1 = vld [vmem:[%s154_s26 + $0x24] ss:$8 sps:$4 sm:$0xff]   ;;  %v449_v2 = vld [vmem:[%s154_s26 + $0x20] ss:$8 sps:$4 sm:$0xff]  }
  0x49   : > { %251 = vmatprep.mubr.bf16.mxu0 %v585_v0  ;;  %229 = vmatprep.subr.bf16.mxu0 %v447_v1  ;;  %v450_v3 = vld [vmem:[%s154_s26 + $0x14] ss:$8 sps:$4 sm:$0xff]   ;;  %v452_v4 = vld [vmem:[%s154_s26 + $0x10] ss:$8 sps:$4 sm:$0xff]   ;;  %v453_v5 = vld [vmem:[%s154_s26 + $0x4] ss:$8 sps:$4 sm:$0xff]  }
  0x4a   : > { %230 = vmatpush1.bf16.msra.mxu0 %v449_v2  ;;  %v455_v6 = vld [vmem:[%s154_s26] ss:$8 sps:$4 sm:$0xff]   ;;  %v178_v7 = vld [vmem:[#allocation2] sm:$0xf]  ;;  %vm215_vm0 = vcmask 392192   ;;  %s369_s20 = sshll.u32 %s726_s19, 4 }
  0x4b   : > { %231 = vmatprep.subr.bf16.mxu0 %v450_v3  ;;  %s383_s23 = sshll.u32 %s623_s13, 8  ;;  %s174_s28 = scalar_lea.vmem [#allocation7], %s369_s20 }
  0x4c   : > { %s279_s7 = sshll.u32 %s174_s28, 4  ;;  %s739_s29 = scalar_lea.hbm %s784_s2, %s383_s23  ;;  %s741_s7 = int_to_ptr.vmem [resolvable:$true] %s279_s7 }
  0x4d   : > { %s265_s13 = scalar_lea.sflag [#allocation4], %s726_s19  ;;  %s510_s30 = scalar_lea.vmem %s741_s7, 256 }
  0x4e   : > { %232 = vmatpush1.bf16.msra.mxu0 %v452_v4  ;;  %p511_p13 = scmp.ne.s32.totalorder %s741_s7, %s510_s30  ;;  %p801_p3 = scmp.ne.s32.totalorder %s791_s21, 0 }
  0x4f   : > { %233 = vmatprep.subr.bf16.mxu0 %v453_v5  ;;  %s586_s27 = smov [#allocation7]  }
  0x50   : > { %p512_p7 = pnand %p511_p13, %p801_p3  ;;  %s514_s3 = sshll.u32 %s586_s27, 4  ;;  %s515_s3 = int_to_ptr.vmem [resolvable:$false] %s514_s3 }
  0x51   : > { %s516_s4 = scalar_lea.vmem %s515_s3, 512  ;;  %p517_p9 = scmp.lt.s32.totalorder %s741_s7, %s515_s3 }
  0x52   : > { %234 = vmatpush1.bf16.msra.mxu0 %v455_v6  ;;  %p513_p8 = pneg %p512_p7  ;;  %p518_p10 = scmp.lt.s32.totalorder %s516_s4, %s510_s30 }
  0x54   : > { %p519_p2 = por %p518_p10, %p517_p9 }
  0x55   : > { %376 = vmatmul.mubr.msk.bf16.vlgmr.msra.gmra.mxu0 %vm215_vm0, %v178_v7 }
  0x56   : > { %p520_p0 = pnand %p519_p2, %p513_p8 }
 0x115   : > { %v253_v8 = vpop.f32.mrf.mxu0 }
 0x116   : > { %v260_v9 = vmax.f32 %v253_v8, 0.0 }
 0x117   : > { %v255_v10 = vpop.f32.mrf.mxu0 }
 0x118   : > { %262 = vst [vmem:[%s174_s28] sm:$0xff] %v260_v9  ;;  %v261_v11 = vmax.f32 %v255_v10, 0.0 }
 0x119   : > { %v257_v12 = vpop.f32.mrf.mxu0 }
 0x11a   : > { %263 = vst [vmem:[%s174_s28 + $0x8] sm:$0xff] %v261_v11 }
 0x11b   : > { %v258_v13 = vpop.f32.mrf.mxu0 }
 0x11c   : > { %523 = shalt.err (!%p520_p0)
}
 0x11d   : > { %s524_s5 = scalar_lea.hbm %s739_s29, 256  ;;  %s528_s14 = scalar_lea.hbm %s784_s2, 512 }
 0x11e   : > { %p525_p4 = scmp.ne.s32.totalorder %s739_s29, %s524_s5  ;;  %p529_p12 = scmp.lt.s32.totalorder %s739_s29, %s784_s2 }
 0x11f   : > { %p530_p1 = scmp.lt.s32.totalorder %s528_s14, %s524_s5 }
 0x120   : > { %p526_p11 = pnand %p525_p4, %p801_p3 }
 0x121   : > { %p531_p6 = por %p530_p1, %p529_p12 }
 0x122   : > { %p527_p5 = pneg %p526_p11 }
 0x124   : > { %p532_p13 = pnand %p531_p6, %p527_p5 }
 0x126   : > { %535 = shalt.err (!%p532_p13)
}
 0x127   : > { %392 = dma.vmem_to_hbm [thread:$0]  (%p801_p3), %s741_s7, 256, %s739_s29, %s265_s13  }
 0x128 PF: > { %s291_s25 = sand.u32 1, %s566_s9   ;;  %p802_p7 = scmp.ne.s32.totalorder %s792_s22, 0 }
 0x129   : > { %p803_p8 = scmp.ge.s32.totalorder %s578_s12, 2  ;;  %s292_s26 = scalar_lea.sflag [#allocation4], %s291_s25 }
 0x12b   : > { %p403_p9 = pnand %p803_p8, %p802_p7 }
 0x12d   : > { %p404_p10 = pneg %p403_p9 }
 0x12f   : > { %561 = dma.done.wait (%p404_p10), %s292_s26, 256  }
 0x130   : > { %563 = vsyncadd (%p404_p10), %s292_s26, 4294967040  ;;  %p16_p2 = scmp.ge.s32.totalorder %s627_s15, 4   ;;  %s804_s9 = smov %s570_s10 }
 0x131   : > { %s805_s10 = smov %s574_s11  ;;  %s806_s11 = smov %s639_s18 }
 0x132   : > { %s807_s12 = smov %s627_s15  ;;  %18 = sbr.rel (!%p16_p2) target bundleno = 6 (0x6), region = 78 }
 0x137   :  { %297 = vsyncpa [#allocation3], 1 }
 0x138   :  { %299 = vsyncpa [#allocation3 + $0x1], 1 }
 0x139   :  { %300 = vsyncpa [#allocation6], 1 }
 0x13a   :  { %302 = vsyncpa [#allocation6 + $0x1], 1 }
 0x13b   :  { %303 = vsyncpa [#allocation4], 1 }
 0x13c   :  { %305 = vsyncpa [#allocation4 + $0x1], 1 }

</bundles_post_ra>
